<compile_context>
chip_gen: v5e
topology: v5e:2x2
jax: 0.10.0
libtpu: 0.0.40
codegen_flags: <defaults>
</compile_context>

<pallas_src>
import jax
import jax.numpy as jnp
from jax.experimental import pallas as pl
from jax.experimental.pallas import tpu as pltpu


def _round_up(x, m):
    return (x + m - 1) // m * m


def _pick_tile(total, unit, cap):
    """Largest multiple of `unit` that divides `total` and is <= cap (>= unit)."""
    best = unit
    t = unit
    limit = min(total, cap)
    while t <= limit:
        if total % t == 0:
            best = t
        t += unit
    return best


def _tpu_vmem_capacity_bytes():
    try:
        return int(pltpu.get_tpu_info().vmem_capacity_bytes)
    except Exception:
        return 64 * 1024 * 1024  # conservative per-TC fallback (v7x)


# ----------------------------------------------------------------------------- kernel
def rbf_kernel(x_ref, ct_ref, pp_ref, o_ref):
    # x_ref:  (TB, D)  f32 batch tile
    # ct_ref: (D, TO)  cached -2 * centers^T (f32 or bf16)
    # pp_ref: (2, TO)  row 0 = ||c||^2, row 1 = -1/(2 w^2)   (f32)
    # o_ref:  (TB, TO) output tile
    x = x_ref[...]
    xn = jnp.sum(x * x, axis=1, keepdims=True)                       # (TB, 1), in-kernel
    xc = jnp.dot(x.astype(ct_ref.dtype), ct_ref[...],
                 preferred_element_type=jnp.float32)                 # (TB, TO) = -2 x.c
    pp = pp_ref[...]
    cn = pp[0:1, :]
    ninv = pp[1:2, :]
    dist2 = jnp.maximum(xn + xc + cn, 0.0)
    o_ref[...] = jnp.exp(dist2 * ninv).astype(o_ref.dtype)


# --------------------------------------------------------------------- cached prep
def prepare_rbf_params(centers, widths, *, param_dtype=jnp.float32):
    """Precompute & pad grid-invariant parameter transforms once (module state).

    centers: (output_dim, input_dim), widths: (output_dim,)
    Returns (centers_t (D, O_p) in param_dtype, cn_ninv (2, O_p) f32, output_dim).
    """
    O, D = centers.shape
    O_p = _round_up(O, 128)
    centers = centers.astype(jnp.float32)
    widths = widths.astype(jnp.float32)

    ct = -2.0 * centers.T                                  # (D, O); -2 folded in
    cn = jnp.sum(centers * centers, axis=1)                # (O,)
    ninv = -0.5 / (widths * widths)                        # (O,)
    if O_p != O:
        ct = jnp.pad(ct, ((0, 0), (0, O_p - O)))
        cn = jnp.pad(cn, (0, O_p - O))
        ninv = jnp.pad(ninv, (0, O_p - O))                 # padded cols -> exp(0)=1, sliced off
    cn_ninv = jnp.stack([cn, ninv], axis=0)                # (2, O_p) f32
    return ct.astype(param_dtype), cn_ninv, O


# ------------------------------------------------------------------------- forward
def rbfnn_forward(x, centers_t, cn_ninv, output_dim, *, tile_b=None, tile_o=None):
    """x: (B, D); centers_t: (D, O_p) cached; cn_ninv: (2, O_p) cached."""
    x = x.astype(jnp.float32)
    B, D = x.shape
    D2, O_p = centers_t.shape
    assert D == D2 and cn_ninv.shape == (2, O_p)
    O = output_dim
    ct_item = jnp.dtype(centers_t.dtype).itemsize

    # ---- generation-aware tile selection -----------------------------------
    vmem_cap = _tpu_vmem_capacity_bytes()
    big_vmem = vmem_cap >= 96 * 1024 * 1024        # v5e/v6e: 128 MiB; v7x: 64 MiB/TC

    if tile_o is None:
        tile_o = _pick_tile(O_p, 128, 2048 if big_vmem else 512)
    if tile_b is None:
        tile_b = min(_round_up(B, 8), 512 if big_vmem else 256)

    # v7x (2 TensorCores): for large problems ensure >=2 steps on a parallel axis.
    if (not big_vmem) and B * O_p >= (1 << 20) and O_p // tile_o < 2 and tile_o > 128:
        tile_o = _pick_tile(O_p, 128, max(128, tile_o // 2))

    # ---- VMEM budget (double-buffered streams), generation-aware -----------
    budget = vmem_cap // 2

    def _vmem_bytes(tb, to):
        return 2 * (tb * D * 4 + D * to * ct_item + 2 * to * 4 + tb * to * 4)

    while _vmem_bytes(tile_b, tile_o) > budget and (tile_o > 128 or tile_b > 8):
        if tile_o > 128:
            tile_o = _pick_tile(O_p, 128, max(128, tile_o // 2))
        else:
            tile_b = max(8, _round_up(tile_b // 2, 8))
    vmem_bytes = _vmem_bytes(tile_b, tile_o)
    assert vmem_bytes <= budget, "tile choice exceeds VMEM budget"
    vmem_limit = int(max(32 * 1024 * 1024,
                         min(vmem_bytes + 16 * 1024 * 1024, (vmem_cap * 3) // 4)))

    # ---- pad only the activation (params are pre-padded & cached) ----------
    B_p = _round_up(B, tile_b)
    if B_p != B:
        x = jnp.pad(x, ((0, B_p - B), (0, 0)))

    n_b = B_p // tile_b
    n_o = O_p // tile_o

    # ---- grid order: re-stream the smaller operand on the inner axis -------
    if B_p * D * 4 <= D * O_p * ct_item:
        grid = (n_o, n_b)                          # centers streamed once, x re-streamed
        x_map = lambda o, b: (b, 0)
        c_map = lambda o, b: (0, o)
        out_map = lambda o, b: (b, o)
    else:
        grid = (n_b, n_o)                          # x streamed once, centers re-streamed
        x_map = lambda b, o: (b, 0)
        c_map = lambda b, o: (0, o)
        out_map = lambda b, o: (b, o)

    out = pl.pallas_call(
        rbf_kernel,
        out_shape=jax.ShapeDtypeStruct((B_p, O_p), jnp.float32),
        grid_spec=pltpu.PrefetchScalarGridSpec(
            num_scalar_prefetch=0,
            grid=grid,
            in_specs=[
                pl.BlockSpec((tile_b, D), x_map),        # x tile
                pl.BlockSpec((D, tile_o), c_map),        # -2 * centers^T tile
                pl.BlockSpec((2, tile_o), c_map),        # [||c||^2 ; -1/(2w^2)] tile
            ],
            out_specs=pl.BlockSpec((tile_b, tile_o), out_map),
        ),
        compiler_params=pltpu.CompilerParams(
            dimension_semantics=("parallel", "parallel"),
            vmem_limit_bytes=vmem_limit,
        ),
        cost_estimate=pl.CostEstimate(
            flops=2 * B * D * O,
            transcendentals=B * O,
            bytes_accessed=B_p * D * 4 + D * O_p * ct_item + 2 * O_p * 4 + B_p * O_p * 4,
        ),
    )(x, centers_t, cn_ninv)

    return out[:B, :O]


# ----------------------------------------------------------------------- reference
def rbfnn_reference(x, centers, widths):
    diff = x[:, None, :] - centers[None, :, :]              # (B, O, D)
    distances = jnp.linalg.norm(diff, axis=2)               # (B, O)
    alpha = distances / jnp.sqrt(2.0 * widths**2)[None, :]
    return jnp.exp(-(alpha**2))


if __name__ == "__main__":
    # Shapes consistent with the module: input_dim=32, output_dim=256, batch=8.
    B, input_dim, output_dim = 8, 32, 256

    key = jax.random.PRNGKey(0)
    kx, kc, kw = jax.random.split(key, 3)
    x = jax.random.normal(kx, (B, input_dim), dtype=jnp.float32)
    centers = jax.random.normal(kc, (output_dim, input_dim), dtype=jnp.float32)  # torch.randn(O, D)
    widths = jax.random.normal(kw, (output_dim,), dtype=jnp.float32)             # torch.randn(O)

    ref = rbfnn_reference(x, centers, widths)

    # Exact path: f32 cached params.
    ct32, pp32, O = prepare_rbf_params(centers, widths, param_dtype=jnp.float32)
    out32 = jax.block_until_ready(rbfnn_forward(x, ct32, pp32, O))
    assert out32.shape == (B, output_dim)
    assert jnp.allclose(out32, ref, atol=1e-4, rtol=1e-4), "f32 path mismatch vs reference"

    # Bandwidth-optimized path: bf16 cached centers (halves HBM bytes of the dominant
    # streamed operand). Small accuracy loss in the x.c term -> looser tolerance.
    ct16, pp16, O = prepare_rbf_params(centers, widths, param_dtype=jnp.bfloat16)
    out16 = jax.block_until_ready(rbfnn_forward(x, ct16, pp16, O))
    assert out16.shape == (B, output_dim)
    assert jnp.allclose(out16, ref, atol=5e-2), "bf16 path out of tolerance"

    print("KERNEL_OK")
</pallas_src>

<mosaic_0001>
module attributes {stable_mosaic.version = 11 : i64} {
  func.func @rbf_kernel(%arg0: i32, %arg1: i32, %arg2: memref<8x32xf32, #tpu.memory_space<vmem>>, %arg3: memref<32x256xf32, #tpu.memory_space<vmem>>, %arg4: memref<2x256xf32, #tpu.memory_space<vmem>>, %arg5: memref<8x256xf32, #tpu.memory_space<vmem>>) attributes {dimension_semantics = [#tpu.dimension_semantics<parallel>, #tpu.dimension_semantics<parallel>], iteration_bounds = array<i64: 1, 1>, scalar_prefetch = 0 : i64, scratch_operands = 0 : i64, tpu.core_type = #tpu.core_type<tc>, window_params = [{transform_indices = @transform_0, window_bounds = array<i64: 8, 32>}, {transform_indices = @transform_1, window_bounds = array<i64: 32, 256>}, {transform_indices = @transform_2, window_bounds = array<i64: 2, 256>}, {transform_indices = @transform_3, window_bounds = array<i64: 8, 256>}]} {
    %c0 = arith.constant 0 : index
    %c0_0 = arith.constant 0 : index
    %0 = vector.load %arg2[%c0, %c0_0] : memref<8x32xf32, #tpu.memory_space<vmem>>, vector<8x32xf32>
    %1 = arith.mulf %0, %0 : vector<8x32xf32>
    %cst = arith.constant dense<0.000000e+00> : vector<8xf32>
    %2 = vector.multi_reduction <add>, %1, %cst [1] : vector<8x32xf32> to vector<8xf32>
    %3 = vector.shape_cast %2 : vector<8xf32> to vector<8x1xf32>
    %c0_1 = arith.constant 0 : index
    %c0_2 = arith.constant 0 : index
    %4 = vector.load %arg3[%c0_1, %c0_2] : memref<32x256xf32, #tpu.memory_space<vmem>>, vector<32x256xf32>
    %cst_3 = arith.constant dense<0.000000e+00> : vector<8x256xf32>
    %5 = tpu.matmul %0, %4, %cst_3 {dimension_numbers = #tpu.dot_dimension_numbers<[1], [0], [0], [1], [0, 0, 1, 1], [], []>} : vector<8x32xf32>, vector<32x256xf32>, vector<8x256xf32> -> vector<8x256xf32>
    %c0_4 = arith.constant 0 : index
    %c0_5 = arith.constant 0 : index
    %6 = vector.load %arg4[%c0_4, %c0_5] : memref<2x256xf32, #tpu.memory_space<vmem>>, vector<2x256xf32>
    %7 = vector.extract_strided_slice %6 {offsets = [0, 0], sizes = [1, 256], strides = [1, 1]} : vector<2x256xf32> to vector<1x256xf32>
    %8 = vector.extract_strided_slice %6 {offsets = [1, 0], sizes = [1, 256], strides = [1, 1]} : vector<2x256xf32> to vector<1x256xf32>
    %9 = vector.broadcast %3 : vector<8x1xf32> to vector<8x256xf32>
    %10 = arith.addf %9, %5 : vector<8x256xf32>
    %11 = vector.broadcast %7 : vector<1x256xf32> to vector<8x256xf32>
    %12 = arith.addf %10, %11 : vector<8x256xf32>
    %cst_6 = arith.constant 0.000000e+00 : f32
    %13 = vector.broadcast %cst_6 : f32 to vector<8x256xf32>
    %14 = arith.maximumf %12, %13 : vector<8x256xf32>
    %15 = vector.broadcast %8 : vector<1x256xf32> to vector<8x256xf32>
    %16 = arith.mulf %14, %15 : vector<8x256xf32>
    %17 = math.exp %16 : vector<8x256xf32>
    %c0_7 = arith.constant 0 : index
    %c0_8 = arith.constant 0 : index
    %18 = vector.load %arg5[%c0_7, %c0_8] : memref<8x256xf32, #tpu.memory_space<vmem>>, vector<8x256xf32>
    tpu.vector_store %arg5[%c0_7, %c0_8], %17 {strides = array<i32>} : memref<8x256xf32, #tpu.memory_space<vmem>>, vector<8x256xf32>,
    return
  }
  func.func @transform_0(%arg0: i32, %arg1: i32) -> (i32, i32) {
    %c0_i32 = arith.constant 0 : i32
    %c0_i32_0 = arith.constant 0 : i32
    return %arg1, %c0_i32 : i32, i32
  }
  func.func @transform_1(%arg0: i32, %arg1: i32) -> (i32, i32) {
    %c0_i32 = arith.constant 0 : i32
    %c0_i32_0 = arith.constant 0 : i32
    return %c0_i32, %arg0 : i32, i32
  }
  func.func @transform_2(%arg0: i32, %arg1: i32) -> (i32, i32) {
    %c0_i32 = arith.constant 0 : i32
    %c0_i32_0 = arith.constant 0 : i32
    return %c0_i32, %arg0 : i32, i32
  }
  func.func @transform_3(%arg0: i32, %arg1: i32) -> (i32, i32) {
    %c0_i32 = arith.constant 0 : i32
    return %arg1, %arg0 : i32, i32
  }
}

</mosaic_0001>

<bundles_post_ra>
// kernel: tpu_custom_call.1
= control target key start
LH: loop header
LB: loop body
LE: loop exit
PB: predicated region body
PF: predicated region fallthrough
CT: control target
= control target key end

     0   :  { %8 = vsyncpa [#allocation3], 0  ;;  %s313_s0 = inlined_call_operand.hbm [shape: f32[8,32], index: 0, kind: input, shape index: {}]   ;;  %s314_s1 = inlined_call_operand.hbm [shape: f32[32,256], index: 1, kind: input, shape index: {}]   ;;  %s315_s2 = inlined_call_operand.hbm [shape: f32[2,256], index: 2, kind: input, shape index: {}]   ;;  %s316_s3 = inlined_call_operand.hbm [shape: f32[8,256], index: 3, kind: output, shape index: {}]  }
   0x1   :  { %9 = vsyncpa [#allocation6], 0  ;;  %s26_s14 = sshll.u32 %s314_s1, 4  ;;  %s27_s14 = int_to_ptr.hbm [resolvable:$true] %s26_s14 }
   0x2   :  { %10 = vsyncpa [#allocation4], 0  ;;  %s275_s15 = smov [#allocation5]   ;;  %s16_s19 = sshll.u32 %s313_s0, 4  ;;  %s17_s19 = int_to_ptr.hbm [resolvable:$true] %s16_s19 }
   0x3   :  { %s28_s16 = sshll.u32 %s275_s15, 4  ;;  %s276_s20 = smov 256   ;;  %s29_s16 = int_to_ptr.vmem [resolvable:$true] %s28_s16 }
   0x4   :  { %s277_s21 = smov 16   ;;  %s278_s22 = smov [#allocation2]  }
   0x5   :  { %34 = dma.hbm_to_vmem [thread:$0]  %s27_s14, 1024, %s29_s16, [#allocation6], %s276_s20, %s276_s20, %s277_s21  }
   0x6   :  { %s18_s23 = sshll.u32 %s278_s22, 4  ;;  %s40_s26 = sshll.u32 %s315_s2, 4  ;;  %s19_s23 = int_to_ptr.vmem [resolvable:$true] %s18_s23  ;;  %s41_s26 = int_to_ptr.hbm [resolvable:$true] %s40_s26 }
   0x7   :  { %21 = dma.hbm_to_vmem [thread:$0]  %s17_s19, 128, %s19_s23, [#allocation3]  }
   0x8   :  { %s279_s1 = smov [#allocation7]  }
   0x9   :  { %s42_s27 = sshll.u32 %s279_s1, 4  ;;  %s43_s27 = int_to_ptr.vmem [resolvable:$true] %s42_s27 }
   0xa   :  { %45 = dma.hbm_to_vmem [thread:$0]  %s41_s26, 64, %s43_s27, [#allocation6]  }
   0xb   :  { %269 = dma.done.wait [#allocation3], 128  }
   0xc   :  { %270 = vsyncadd [#allocation3], 4294967168 }
   0xd   :  { %271 = dma.done.wait [#allocation6], 1088  }
   0xe   :  { %272 = vsyncadd [#allocation6], 4294966208  ;;  %v70_v0 = vld [vmem:[#allocation5 + $0x30] sm:$0xff]  ;;  %v71_v1 = vld [vmem:[#allocation5 + $0x38] sm:$0xff]  ;;  %vm60_vm0 = vcmask 261120   ;;  %s280_s0 = smov [#allocation8]  }
   0xf   :  { %v68_v2 = vld [vmem:[#allocation5 + $0x20] sm:$0xff]  ;;  %87 = vmatpush.msra.mxu0 %v70_v0  ;;  %107 = vmatpush.msra.mxu1 %v71_v1  ;;  %v69_v3 = vld [vmem:[#allocation5 + $0x28] sm:$0xff]  ;;  %v66_v4 = vld [vmem:[#allocation5 + $0x10] sm:$0xff]  ;;  %s148_s2 = sshll.u32 %s280_s0, 4  ;;  %s150_s30 = sshll.u32 %s316_s3, 4  ;;  %s149_s2 = int_to_ptr.vmem [resolvable:$true] %s148_s2  ;;  %s151_s30 = int_to_ptr.hbm [resolvable:$true] %s150_s30 }
  0x10   :  { %v67_v5 = vld [vmem:[#allocation5 + $0x18] sm:$0xff]  ;;  %v64_v8 = vld [vmem:[#allocation5] sm:$0xff]  ;;  %v65_v9 = vld [vmem:[#allocation5 + $0x8] sm:$0xff] }
  0x11   :  { %v58_v6 = vld [vmem:[#allocation2] sm:$0xff]  ;;  %88 = vmatpush.msra.mxu0 %v68_v2  ;;  %108 = vmatpush.msra.mxu1 %v69_v3  ;;  %v115_v11 = vld [vmem:[#allocation7] sm:$0xf] }
  0x12   :  { %v59_v7 = vmul.f32 %v58_v6, %v58_v6  ;;  %v119_v12 = vperm.slane %v115_v11, 0  ;;  %v120_v13 = vperm.slane %v115_v11, 2  ;;  %v129_v16 = vperm.slane %v115_v11, 1 }
  0x13   :  { %89 = vmatpush.msra.mxu0 %v66_v4  ;;  %109 = vmatpush.msra.mxu1 %v67_v5  ;;  %v130_v18 = vperm.slane %v115_v11, 3 }
  0x14   :  { %v61_v10 = vsel %vm60_vm0, %v59_v7, 0.0  ;;  %v123_v15 = vperm.slane %v119_v12, 0  ;;  %v124_v17 = vperm.slane %v120_v13, 0  ;;  %v133_v24 = vperm.slane %v129_v16, 1 }
  0x15   :  { %62 = vadd.xlane.f32.xlu0 %v61_v10  ;;  %90 = vmatpush.msra.mxu0 %v64_v8  ;;  %v134_v26 = vperm.slane %v130_v18, 1 }
  0x16   :  { %110 = vmatpush.msra.mxu1 %v65_v9  ;;  %161 = vmatmul.msk.f32.vlgmr.msra.gmra.mxu0 %vm60_vm0, %v58_v6 }
  0x17   :  { %162 = vmatmul.msk.f32.vlgmr.msra.gmra.mxu1 %vm60_vm0, %v58_v6 }
  0x88   :  { %v63_v14 = vpop.xlane.xlu0 %62 }
  0x93   :  { %v92_v19 = vpop.f32.mrf.mxu0 }
  0x94   :  { %v112_v20 = vpop.f32.mrf.mxu1  ;;  %v116_v21 = vadd.f32 %v92_v19, %v63_v14 }
  0x95   :  { %v117_v22 = vadd.f32 %v112_v20, %v63_v14 }
  0x96   :  { %v125_v23 = vadd.f32 %v123_v15, %v116_v21 }
  0x97   :  { %v126_v25 = vadd.f32 %v124_v17, %v117_v22 }
  0x98   :  { %v127_v27 = vmax.f32 %v125_v23, 0.0 }
  0x99   :  { %v128_v28 = vmax.f32 %v126_v25, 0.0 }
  0x9a   :  { %v135_v29 = vmul.f32 %v133_v24, %v127_v27 }
  0x9b   :  { %v136_v30 = vmul.f32 %v134_v26, %v128_v28 }
  0x9c   :  { %v137_v31 = vmul.f32 1.442695, %v135_v29 }
  0x9d   :  { %v139_v32 = vmul.f32 1.442695, %v136_v30 }
  0x9e   :  { %169 = vpow2.f32 %v137_v31 }
  0x9f   :  { %171 = vpow2.f32 %v139_v32 }
  0xa4   :  { %v170_v33 = vpop.eup %169 }
  0xa5   :  { %v172_v34 = vpop.eup %171  ;;  %141 = vst [vmem:[#allocation8] sm:$0xff] %v170_v33 }
  0xa6   :  { %142 = vst [vmem:[#allocation8 + $0x8] sm:$0xff] %v172_v34 }
  0xa7   :  { %153 = dma.vmem_to_hbm [thread:$0]  %s149_s2, 256, %s151_s30, [#allocation4]  }
  0xa8   :  { %273 = dma.done.wait [#allocation4], 256  }
  0xa9   :  { %274 = vsyncadd [#allocation4], 4294967040 }
  0xaa   :  { %158 = vsyncpa [#allocation3], 1 }
  0xab   :  { %159 = vsyncpa [#allocation6], 1 }
  0xac   :  { %160 = vsyncpa [#allocation4], 1 }

</bundles_post_ra>
